<compile_context>
chip_gen: v7x
topology: tpu7x:2x2x1
jax: 0.10.0
libtpu: 0.0.40
codegen_flags: <defaults>
</compile_context>

<pallas_src>
import jax
import jax.numpy as jnp
from jax.experimental import pallas as pl
from jax.experimental.pallas import tpu as pltpu


# ---------------------------------------------------------------------------
# Fused kernel (all layers + final linear), one batch element per grid step
# ---------------------------------------------------------------------------

def _make_fftnet_kernel(shifts, T):
    n_layers = len(shifts)

    def kernel(*refs):
        i = 0
        x1 = refs[i][...]; i += 1          # (1, T)
        x2 = refs[i][...]; i += 1          # (1, T)
        hh = refs[i][...]; i += 1          # (lc, T), already trimmed to last T
        layer_refs = []
        for _ in range(n_layers):
            layer_refs.append(refs[i:i + 4])   # (w_in, b_in, w_out, b_out)
            i += 4
        lin_w = refs[i][...]
        lin_b = refs[i + 1][...]
        out_ref = refs[i + 2]

        def mm(w, x):
            # MXU matmul with f32 accumulation; activations cast to the
            # (possibly bf16) weight dtype so both operands use the native
            # MXU path.
            return jnp.dot(w, x.astype(w.dtype),
                           preferred_element_type=jnp.float32)

        def block(x_cat, w_in, b_in, w_out, b_out):
            # z_pre == x1_l + x1_r (+ x2_l + x2_r + h_l + h_r): the fused
            # matmul with pre-summed biases is exactly the residual term.
            z_pre = mm(w_in, x_cat) + b_in
            z = jnp.maximum(z_pre, 0.0)
            return jnp.maximum(mm(w_out, z) + b_out + z_pre, 0.0)

        # ---- first block: x1, x2 and local condition h all feed in --------
        s = shifts[0]
        Tc = T
        x_cat = jnp.concatenate(
            [x1[:, : Tc - s], x1[:, s:],
             x2[:, : Tc - s], x2[:, s:],
             hh[:, : Tc - s], hh[:, s:]], axis=0)
        w_in_r, b_in_r, w_out_r, b_out_r = layer_refs[0]
        act = block(x_cat, w_in_r[...], b_in_r[...], w_out_r[...], b_out_r[...])
        Tc -= s

        # ---- remaining blocks (x2=None, h=None) ----------------------------
        for li in range(1, n_layers):
            s = shifts[li]
            x_cat = jnp.concatenate([act[:, : Tc - s], act[:, s:]], axis=0)
            w_in_r, b_in_r, w_out_r, b_out_r = layer_refs[li]
            act = block(x_cat, w_in_r[...], b_in_r[...], w_out_r[...],
                        b_out_r[...])
            Tc -= s

        # ---- final Linear over channels; output stays NCT (Q, T_out) ------
        out_ref[...] = (mm(lin_w, act) + lin_b).astype(out_ref.dtype)

    return kernel


# ---------------------------------------------------------------------------
# BlockSpec helpers
# ---------------------------------------------------------------------------

def _nct_spec(C, T):
    # One batch element per grid step; batch dim squeezed out of the ref.
    return pl.BlockSpec((None, C, T), lambda b: (b, 0, 0))


def _full_spec(a):
    nd = a.ndim
    return pl.BlockSpec(a.shape, lambda b, _nd=nd: (0,) * _nd)


def _cost_estimate(B, args, layers, T, Q, T_out):
    flops = 0
    Tc = T
    for layer in layers:
        s = layer["shift"]
        To = Tc - s
        Cout, K_in = layer["w_in"].shape
        flops += 2 * To * K_in * Cout            # fused L/R (+x2/h) conv
        flops += 2 * To * Cout * Cout            # output conv
        Tc = To
    C = layers[-1]["w_out"].shape[0]
    flops += 2 * T_out * C * Q                   # final linear
    flops *= B
    bytes_accessed = sum(int(a.size) * a.dtype.itemsize for a in args)
    bytes_accessed += B * Q * T_out * 4          # output writeback
    return pl.CostEstimate(flops=flops, transcendentals=0,
                           bytes_accessed=bytes_accessed)


# ---------------------------------------------------------------------------
# Parameter init (deterministic, synthetic).  Weights are produced pre-fused:
#   w_in  = concat([w1l, w1r (, w2l, w2r, whl, whr)], axis=1)   (Cout, K)
#   b_in  = b1l + b1r (+ b2l + b2r + bhl + bhr)                 (Cout, 1)
# ---------------------------------------------------------------------------

def _conv_params(key, c_in, c_out):
    kw, kb = jax.random.split(key)
    scale = 1.0 / float(c_in) ** 0.5
    w = jax.random.uniform(kw, (c_out, c_in), jnp.float32, -scale, scale)
    b = jax.random.uniform(kb, (c_out, 1), jnp.float32, -scale, scale)
    return w, b


def init_fftnet_params(key, n_stacks, fft_channels, quant_channels, lc_channels):
    window_shifts = [2 ** i for i in range(n_stacks)]
    layers = []
    for shift in reversed(window_shifts):
        first = shift == window_shifts[-1]
        in_ch = 1 if first else fft_channels
        key, *ks = jax.random.split(key, 8)
        w1l, b1l = _conv_params(ks[0], in_ch, fft_channels)
        w1r, b1r = _conv_params(ks[1], in_ch, fft_channels)
        if first:
            w2l, b2l = _conv_params(ks[2], in_ch, fft_channels)
            w2r, b2r = _conv_params(ks[3], in_ch, fft_channels)
            whl, bhl = _conv_params(ks[4], lc_channels, fft_channels)
            whr, bhr = _conv_params(ks[5], lc_channels, fft_channels)
            w_in = jnp.concatenate([w1l, w1r, w2l, w2r, whl, whr], axis=1)
            b_in = b1l + b1r + b2l + b2r + bhl + bhr
        else:
            w_in = jnp.concatenate([w1l, w1r], axis=1)
            b_in = b1l + b1r
        w_out, b_out = _conv_params(ks[6], fft_channels, fft_channels)
        layers.append({"shift": shift, "w_in": w_in, "b_in": b_in,
                       "w_out": w_out, "b_out": b_out})
    key, kl = jax.random.split(key)
    lin_w, lin_b = _conv_params(kl, fft_channels, quant_channels)
    return {"layers": layers, "lin_w": lin_w, "lin_b": lin_b,
            "window_shifts": window_shifts}


# ---------------------------------------------------------------------------
# FFTNet forward (single fused pallas_call)
# ---------------------------------------------------------------------------

def fftnet_forward(params, x1, x2, h, use_bf16=True):
    """x1, x2: (B, T, 1) f32;  h: (B, C_lc, T_h) f32 (NCT like PyTorch).
    Returns (B, quantization_channels, T - sum(shifts)) in NCT layout."""
    B, T, _ = x1.shape
    x1_nct = jnp.transpose(x1, (0, 2, 1))          # (B, 1, T)
    x2_nct = jnp.transpose(x2, (0, 2, 1))          # (B, 1, T)
    h_nct = h[:, :, -T:]                           # trim like the first block
    lc = h_nct.shape[1]

    # TODO(synk): the (x2 given, h=None) branch of FFTNetBlock references
    # undefined x_l/x_r in the PyTorch source (NameError) and is not
    # implemented; first block here requires both x2 and h.

    shifts = tuple(layer["shift"] for layer in params["layers"])
    T_out = T - sum(shifts)
    Q = params["lin_w"].shape[0]
    w_dtype = jnp.bfloat16 if use_bf16 else jnp.float32

    args = [x1_nct, x2_nct, h_nct]
    in_specs = [_nct_spec(1, T), _nct_spec(1, T), _nct_spec(lc, T)]
    for layer in params["layers"]:
        for name in ("w_in", "b_in", "w_out", "b_out"):
            a = layer[name]
            if name.startswith("w"):
                a = a.astype(w_dtype)
            args.append(a)
            in_specs.append(_full_spec(a))
    for a in (params["lin_w"].astype(w_dtype), params["lin_b"]):
        args.append(a)
        in_specs.append(_full_spec(a))

    kernel = _make_fftnet_kernel(shifts, T)
    cost = _cost_estimate(B, args, params["layers"], T, Q, T_out)

    return pl.pallas_call(
        kernel,
        out_shape=jax.ShapeDtypeStruct((B, Q, T_out), jnp.float32),
        grid=(B,),
        in_specs=in_specs,
        out_specs=pl.BlockSpec((None, Q, T_out), lambda b: (b, 0, 0)),
        compiler_params=pltpu.CompilerParams(
            dimension_semantics=("parallel",)),
        cost_estimate=cost,
    )(*args)


# ---------------------------------------------------------------------------
# Main
# ---------------------------------------------------------------------------

if __name__ == "__main__":
    B = 2
    n_stacks = 3            # shifts = [1, 2, 4], receptive_field = 8
    fft_channels = 32
    quant_channels = 32
    lc_channels = 4
    T = 16                  # input length (> sum(shifts))
    T_h = 20                # local condition longer than T; trimmed to last T

    key = jax.random.PRNGKey(0)
    k1, k2, k3, kp = jax.random.split(key, 4)
    x1 = jax.random.normal(k1, (B, T, 1), jnp.float32)
    x2 = jax.random.normal(k2, (B, T, 1), jnp.float32)
    h = jax.random.normal(k3, (B, lc_channels, T_h), jnp.float32)

    params = init_fftnet_params(kp, n_stacks, fft_channels, quant_channels,
                                lc_channels)

    out = fftnet_forward(params, x1, x2, h)
    out = jax.block_until_ready(out)

    expected_T_out = T - sum(2 ** i for i in range(n_stacks))
    assert out.shape == (B, quant_channels, expected_T_out), out.shape
    assert bool(jnp.all(jnp.isfinite(out)))
    print("KERNEL_OK")
</pallas_src>

<mosaic_0001>
module attributes {stable_mosaic.version = 11 : i64} {
  func.func @kernel(%arg0: i32, %arg1: memref<1x1x16xf32, #tpu.memory_space<vmem>>, %arg2: memref<1x1x16xf32, #tpu.memory_space<vmem>>, %arg3: memref<1x4x16xf32, #tpu.memory_space<vmem>>, %arg4: memref<32x12xbf16, #tpu.memory_space<vmem>>, %arg5: memref<32x1xf32, #tpu.memory_space<vmem>>, %arg6: memref<32x32xbf16, #tpu.memory_space<vmem>>, %arg7: memref<32x1xf32, #tpu.memory_space<vmem>>, %arg8: memref<32x64xbf16, #tpu.memory_space<vmem>>, %arg9: memref<32x1xf32, #tpu.memory_space<vmem>>, %arg10: memref<32x32xbf16, #tpu.memory_space<vmem>>, %arg11: memref<32x1xf32, #tpu.memory_space<vmem>>, %arg12: memref<32x64xbf16, #tpu.memory_space<vmem>>, %arg13: memref<32x1xf32, #tpu.memory_space<vmem>>, %arg14: memref<32x32xbf16, #tpu.memory_space<vmem>>, %arg15: memref<32x1xf32, #tpu.memory_space<vmem>>, %arg16: memref<32x32xbf16, #tpu.memory_space<vmem>>, %arg17: memref<32x1xf32, #tpu.memory_space<vmem>>, %arg18: memref<1x32x9xf32, #tpu.memory_space<vmem>>) attributes {dimension_semantics = [#tpu.dimension_semantics<parallel>], iteration_bounds = array<i64: 2>, scalar_prefetch = 0 : i64, scratch_operands = 0 : i64, tpu.core_type = #tpu.core_type<tc>, window_params = [{transform_indices = @transform_0, window_bounds = array<i64: 1, 1, 16>}, {transform_indices = @transform_1, window_bounds = array<i64: 1, 1, 16>}, {transform_indices = @transform_2, window_bounds = array<i64: 1, 4, 16>}, {pipeline_mode = #tpu.pipeline_mode<synchronous>, transform_indices = @transform_3, window_bounds = array<i64: 32, 12>}, {pipeline_mode = #tpu.pipeline_mode<synchronous>, transform_indices = @transform_4, window_bounds = array<i64: 32, 1>}, {pipeline_mode = #tpu.pipeline_mode<synchronous>, transform_indices = @transform_5, window_bounds = array<i64: 32, 32>}, {pipeline_mode = #tpu.pipeline_mode<synchronous>, transform_indices = @transform_6, window_bounds = array<i64: 32, 1>}, {pipeline_mode = #tpu.pipeline_mode<synchronous>, transform_indices = @transform_7, window_bounds = array<i64: 32, 64>}, {pipeline_mode = #tpu.pipeline_mode<synchronous>, transform_indices = @transform_8, window_bounds = array<i64: 32, 1>}, {pipeline_mode = #tpu.pipeline_mode<synchronous>, transform_indices = @transform_9, window_bounds = array<i64: 32, 32>}, {pipeline_mode = #tpu.pipeline_mode<synchronous>, transform_indices = @transform_10, window_bounds = array<i64: 32, 1>}, {pipeline_mode = #tpu.pipeline_mode<synchronous>, transform_indices = @transform_11, window_bounds = array<i64: 32, 64>}, {pipeline_mode = #tpu.pipeline_mode<synchronous>, transform_indices = @transform_12, window_bounds = array<i64: 32, 1>}, {pipeline_mode = #tpu.pipeline_mode<synchronous>, transform_indices = @transform_13, window_bounds = array<i64: 32, 32>}, {pipeline_mode = #tpu.pipeline_mode<synchronous>, transform_indices = @transform_14, window_bounds = array<i64: 32, 1>}, {pipeline_mode = #tpu.pipeline_mode<synchronous>, transform_indices = @transform_15, window_bounds = array<i64: 32, 32>}, {pipeline_mode = #tpu.pipeline_mode<synchronous>, transform_indices = @transform_16, window_bounds = array<i64: 32, 1>}, {transform_indices = @transform_17, window_bounds = array<i64: 1, 32, 9>}]} {
    %c0 = arith.constant 0 : index
    %c0_0 = arith.constant 0 : index
    %c0_1 = arith.constant 0 : index
    %0 = vector.load %arg1[%c0, %c0_0, %c0_1] : memref<1x1x16xf32, #tpu.memory_space<vmem>>, vector<1x1x16xf32>
    %1 = vector.shape_cast %0 : vector<1x1x16xf32> to vector<1x16xf32>
    %c0_2 = arith.constant 0 : index
    %c0_3 = arith.constant 0 : index
    %c0_4 = arith.constant 0 : index
    %2 = vector.load %arg2[%c0_2, %c0_3, %c0_4] : memref<1x1x16xf32, #tpu.memory_space<vmem>>, vector<1x1x16xf32>
    %3 = vector.shape_cast %2 : vector<1x1x16xf32> to vector<1x16xf32>
    %c0_5 = arith.constant 0 : index
    %c0_6 = arith.constant 0 : index
    %c0_7 = arith.constant 0 : index
    %4 = vector.load %arg3[%c0_5, %c0_6, %c0_7] : memref<1x4x16xf32, #tpu.memory_space<vmem>>, vector<1x4x16xf32>
    %5 = vector.shape_cast %4 : vector<1x4x16xf32> to vector<4x16xf32>
    %c0_8 = arith.constant 0 : index
    %c0_9 = arith.constant 0 : index
    %6 = vector.load %arg16[%c0_8, %c0_9] : memref<32x32xbf16, #tpu.memory_space<vmem>>, vector<32x32xbf16>
    %c0_10 = arith.constant 0 : index
    %c0_11 = arith.constant 0 : index
    %7 = vector.load %arg17[%c0_10, %c0_11] : memref<32x1xf32, #tpu.memory_space<vmem>>, vector<32x1xf32>
    %8 = vector.extract_strided_slice %1 {offsets = [0, 0], sizes = [1, 12], strides = [1, 1]} : vector<1x16xf32> to vector<1x12xf32>
    %9 = vector.extract_strided_slice %1 {offsets = [0, 4], sizes = [1, 12], strides = [1, 1]} : vector<1x16xf32> to vector<1x12xf32>
    %10 = vector.extract_strided_slice %3 {offsets = [0, 0], sizes = [1, 12], strides = [1, 1]} : vector<1x16xf32> to vector<1x12xf32>
    %11 = vector.extract_strided_slice %3 {offsets = [0, 4], sizes = [1, 12], strides = [1, 1]} : vector<1x16xf32> to vector<1x12xf32>
    %12 = vector.extract_strided_slice %5 {offsets = [0, 0], sizes = [4, 12], strides = [1, 1]} : vector<4x16xf32> to vector<4x12xf32>
    %13 = vector.extract_strided_slice %5 {offsets = [0, 4], sizes = [4, 12], strides = [1, 1]} : vector<4x16xf32> to vector<4x12xf32>
    %14 = tpu.concatenate %8, %9, %10, %11, %12, %13 in 0 : vector<1x12xf32>, vector<1x12xf32>, vector<1x12xf32>, vector<1x12xf32>, vector<4x12xf32>, vector<4x12xf32> -> vector<12x12xf32>
    %c0_12 = arith.constant 0 : index
    %c0_13 = arith.constant 0 : index
    %15 = vector.load %arg4[%c0_12, %c0_13] : memref<32x12xbf16, #tpu.memory_space<vmem>>, vector<32x12xbf16>
    %c0_14 = arith.constant 0 : index
    %c0_15 = arith.constant 0 : index
    %16 = vector.load %arg5[%c0_14, %c0_15] : memref<32x1xf32, #tpu.memory_space<vmem>>, vector<32x1xf32>
    %c0_16 = arith.constant 0 : index
    %c0_17 = arith.constant 0 : index
    %17 = vector.load %arg6[%c0_16, %c0_17] : memref<32x32xbf16, #tpu.memory_space<vmem>>, vector<32x32xbf16>
    %c0_18 = arith.constant 0 : index
    %c0_19 = arith.constant 0 : index
    %18 = vector.load %arg7[%c0_18, %c0_19] : memref<32x1xf32, #tpu.memory_space<vmem>>, vector<32x1xf32>
    %19 = arith.truncf %14 : vector<12x12xf32> to vector<12x12xbf16>
    %cst = arith.constant dense<0.000000e+00> : vector<32x12xf32>
    %20 = tpu.matmul %15, %19, %cst {dimension_numbers = #tpu.dot_dimension_numbers<[1], [0], [0], [1], [0, 0, 1, 1], [], []>} : vector<32x12xbf16>, vector<12x12xbf16>, vector<32x12xf32> -> vector<32x12xf32>
    %21 = vector.broadcast %16 : vector<32x1xf32> to vector<32x12xf32>
    %22 = arith.addf %20, %21 : vector<32x12xf32>
    %cst_20 = arith.constant 0.000000e+00 : f32
    %23 = vector.broadcast %cst_20 : f32 to vector<32x12xf32>
    %24 = arith.maximumf %22, %23 : vector<32x12xf32>
    %25 = arith.truncf %24 : vector<32x12xf32> to vector<32x12xbf16>
    %cst_21 = arith.constant dense<0.000000e+00> : vector<32x12xf32>
    %26 = tpu.matmul %17, %25, %cst_21 {dimension_numbers = #tpu.dot_dimension_numbers<[1], [0], [0], [1], [0, 0, 1, 1], [], []>} : vector<32x32xbf16>, vector<32x12xbf16>, vector<32x12xf32> -> vector<32x12xf32>
    %27 = vector.broadcast %18 : vector<32x1xf32> to vector<32x12xf32>
    %28 = arith.addf %26, %27 : vector<32x12xf32>
    %29 = arith.addf %28, %22 : vector<32x12xf32>
    %cst_22 = arith.constant 0.000000e+00 : f32
    %30 = vector.broadcast %cst_22 : f32 to vector<32x12xf32>
    %31 = arith.maximumf %29, %30 : vector<32x12xf32>
    %32 = vector.extract_strided_slice %31 {offsets = [0, 0], sizes = [32, 10], strides = [1, 1]} : vector<32x12xf32> to vector<32x10xf32>
    %33 = vector.extract_strided_slice %31 {offsets = [0, 2], sizes = [32, 10], strides = [1, 1]} : vector<32x12xf32> to vector<32x10xf32>
    %34 = tpu.concatenate %32, %33 in 0 : vector<32x10xf32>, vector<32x10xf32> -> vector<64x10xf32>
    %c0_23 = arith.constant 0 : index
    %c0_24 = arith.constant 0 : index
    %35 = vector.load %arg8[%c0_23, %c0_24] : memref<32x64xbf16, #tpu.memory_space<vmem>>, vector<32x64xbf16>
    %c0_25 = arith.constant 0 : index
    %c0_26 = arith.constant 0 : index
    %36 = vector.load %arg9[%c0_25, %c0_26] : memref<32x1xf32, #tpu.memory_space<vmem>>, vector<32x1xf32>
    %c0_27 = arith.constant 0 : index
    %c0_28 = arith.constant 0 : index
    %37 = vector.load %arg10[%c0_27, %c0_28] : memref<32x32xbf16, #tpu.memory_space<vmem>>, vector<32x32xbf16>
    %c0_29 = arith.constant 0 : index
    %c0_30 = arith.constant 0 : index
    %38 = vector.load %arg11[%c0_29, %c0_30] : memref<32x1xf32, #tpu.memory_space<vmem>>, vector<32x1xf32>
    %39 = arith.truncf %34 : vector<64x10xf32> to vector<64x10xbf16>
    %cst_31 = arith.constant dense<0.000000e+00> : vector<32x10xf32>
    %40 = tpu.matmul %35, %39, %cst_31 {dimension_numbers = #tpu.dot_dimension_numbers<[1], [0], [0], [1], [0, 0, 1, 1], [], []>} : vector<32x64xbf16>, vector<64x10xbf16>, vector<32x10xf32> -> vector<32x10xf32>
    %41 = vector.broadcast %36 : vector<32x1xf32> to vector<32x10xf32>
    %42 = arith.addf %40, %41 : vector<32x10xf32>
    %cst_32 = arith.constant 0.000000e+00 : f32
    %43 = vector.broadcast %cst_32 : f32 to vector<32x10xf32>
    %44 = arith.maximumf %42, %43 : vector<32x10xf32>
    %45 = arith.truncf %44 : vector<32x10xf32> to vector<32x10xbf16>
    %cst_33 = arith.constant dense<0.000000e+00> : vector<32x10xf32>
    %46 = tpu.matmul %37, %45, %cst_33 {dimension_numbers = #tpu.dot_dimension_numbers<[1], [0], [0], [1], [0, 0, 1, 1], [], []>} : vector<32x32xbf16>, vector<32x10xbf16>, vector<32x10xf32> -> vector<32x10xf32>
    %47 = vector.broadcast %38 : vector<32x1xf32> to vector<32x10xf32>
    %48 = arith.addf %46, %47 : vector<32x10xf32>
    %49 = arith.addf %48, %42 : vector<32x10xf32>
    %cst_34 = arith.constant 0.000000e+00 : f32
    %50 = vector.broadcast %cst_34 : f32 to vector<32x10xf32>
    %51 = arith.maximumf %49, %50 : vector<32x10xf32>
    %52 = vector.extract_strided_slice %51 {offsets = [0, 0], sizes = [32, 9], strides = [1, 1]} : vector<32x10xf32> to vector<32x9xf32>
    %53 = vector.extract_strided_slice %51 {offsets = [0, 1], sizes = [32, 9], strides = [1, 1]} : vector<32x10xf32> to vector<32x9xf32>
    %54 = tpu.concatenate %52, %53 in 0 : vector<32x9xf32>, vector<32x9xf32> -> vector<64x9xf32>
    %c0_35 = arith.constant 0 : index
    %c0_36 = arith.constant 0 : index
    %55 = vector.load %arg12[%c0_35, %c0_36] : memref<32x64xbf16, #tpu.memory_space<vmem>>, vector<32x64xbf16>
    %c0_37 = arith.constant 0 : index
    %c0_38 = arith.constant 0 : index
    %56 = vector.load %arg13[%c0_37, %c0_38] : memref<32x1xf32, #tpu.memory_space<vmem>>, vector<32x1xf32>
    %c0_39 = arith.constant 0 : index
    %c0_40 = arith.constant 0 : index
    %57 = vector.load %arg14[%c0_39, %c0_40] : memref<32x32xbf16, #tpu.memory_space<vmem>>, vector<32x32xbf16>
    %c0_41 = arith.constant 0 : index
    %c0_42 = arith.constant 0 : index
    %58 = vector.load %arg15[%c0_41, %c0_42] : memref<32x1xf32, #tpu.memory_space<vmem>>, vector<32x1xf32>
    %59 = arith.truncf %54 : vector<64x9xf32> to vector<64x9xbf16>
    %cst_43 = arith.constant dense<0.000000e+00> : vector<32x9xf32>
    %60 = tpu.matmul %55, %59, %cst_43 {dimension_numbers = #tpu.dot_dimension_numbers<[1], [0], [0], [1], [0, 0, 1, 1], [], []>} : vector<32x64xbf16>, vector<64x9xbf16>, vector<32x9xf32> -> vector<32x9xf32>
    %61 = vector.broadcast %56 : vector<32x1xf32> to vector<32x9xf32>
    %62 = arith.addf %60, %61 : vector<32x9xf32>
    %cst_44 = arith.constant 0.000000e+00 : f32
    %63 = vector.broadcast %cst_44 : f32 to vector<32x9xf32>
    %64 = arith.maximumf %62, %63 : vector<32x9xf32>
    %65 = arith.truncf %64 : vector<32x9xf32> to vector<32x9xbf16>
    %cst_45 = arith.constant dense<0.000000e+00> : vector<32x9xf32>
    %66 = tpu.matmul %57, %65, %cst_45 {dimension_numbers = #tpu.dot_dimension_numbers<[1], [0], [0], [1], [0, 0, 1, 1], [], []>} : vector<32x32xbf16>, vector<32x9xbf16>, vector<32x9xf32> -> vector<32x9xf32>
    %67 = vector.broadcast %58 : vector<32x1xf32> to vector<32x9xf32>
    %68 = arith.addf %66, %67 : vector<32x9xf32>
    %69 = arith.addf %68, %62 : vector<32x9xf32>
    %cst_46 = arith.constant 0.000000e+00 : f32
    %70 = vector.broadcast %cst_46 : f32 to vector<32x9xf32>
    %71 = arith.maximumf %69, %70 : vector<32x9xf32>
    %72 = arith.truncf %71 : vector<32x9xf32> to vector<32x9xbf16>
    %cst_47 = arith.constant dense<0.000000e+00> : vector<32x9xf32>
    %73 = tpu.matmul %6, %72, %cst_47 {dimension_numbers = #tpu.dot_dimension_numbers<[1], [0], [0], [1], [0, 0, 1, 1], [], []>} : vector<32x32xbf16>, vector<32x9xbf16>, vector<32x9xf32> -> vector<32x9xf32>
    %74 = vector.broadcast %7 : vector<32x1xf32> to vector<32x9xf32>
    %75 = arith.addf %73, %74 : vector<32x9xf32>
    %c0_48 = arith.constant 0 : index
    %c0_49 = arith.constant 0 : index
    %c0_50 = arith.constant 0 : index
    %76 = vector.load %arg18[%c0_48, %c0_49, %c0_50] : memref<1x32x9xf32, #tpu.memory_space<vmem>>, vector<1x32x9xf32>
    %77 = vector.shape_cast %76 : vector<1x32x9xf32> to vector<32x9xf32>
    %78 = vector.shape_cast %75 : vector<32x9xf32> to vector<1x32x9xf32>
    tpu.vector_store %arg18[%c0_48, %c0_49, %c0_50], %78 {strides = array<i32>} : memref<1x32x9xf32, #tpu.memory_space<vmem>>, vector<1x32x9xf32>,
    return
  }
  func.func @transform_0(%arg0: i32) -> (i32, i32, i32) {
    %c0_i32 = arith.constant 0 : i32
    %c0_i32_0 = arith.constant 0 : i32
    %c0_i32_1 = arith.constant 0 : i32
    return %arg0, %c0_i32, %c0_i32_0 : i32, i32, i32
  }
  func.func @transform_1(%arg0: i32) -> (i32, i32, i32) {
    %c0_i32 = arith.constant 0 : i32
    %c0_i32_0 = arith.constant 0 : i32
    %c0_i32_1 = arith.constant 0 : i32
    return %arg0, %c0_i32, %c0_i32_0 : i32, i32, i32
  }
  func.func @transform_2(%arg0: i32) -> (i32, i32, i32) {
    %c0_i32 = arith.constant 0 : i32
    %c0_i32_0 = arith.constant 0 : i32
    %c0_i32_1 = arith.constant 0 : i32
    return %arg0, %c0_i32, %c0_i32_0 : i32, i32, i32
  }
  func.func @transform_3(%arg0: i32) -> (i32, i32) {
    %c0_i32 = arith.constant 0 : i32
    %c0_i32_0 = arith.constant 0 : i32
    %c0_i32_1 = arith.constant 0 : i32
    return %c0_i32, %c0_i32_0 : i32, i32
  }
  func.func @transform_4(%arg0: i32) -> (i32, i32) {
    %c0_i32 = arith.constant 0 : i32
    %c0_i32_0 = arith.constant 0 : i32
    %c0_i32_1 = arith.constant 0 : i32
    return %c0_i32, %c0_i32_0 : i32, i32
  }
  func.func @transform_5(%arg0: i32) -> (i32, i32) {
    %c0_i32 = arith.constant 0 : i32
    %c0_i32_0 = arith.constant 0 : i32
    %c0_i32_1 = arith.constant 0 : i32
    return %c0_i32, %c0_i32_0 : i32, i32
  }
  func.func @transform_6(%arg0: i32) -> (i32, i32) {
    %c0_i32 = arith.constant 0 : i32
    %c0_i32_0 = arith.constant 0 : i32
    %c0_i32_1 = arith.constant 0 : i32
    return %c0_i32, %c0_i32_0 : i32, i32
  }
  func.func @transform_7(%arg0: i32) -> (i32, i32) {
    %c0_i32 = arith.constant 0 : i32
    %c0_i32_0 = arith.constant 0 : i32
    %c0_i32_1 = arith.constant 0 : i32
    return %c0_i32, %c0_i32_0 : i32, i32
  }
  func.func @transform_8(%arg0: i32) -> (i32, i32) {
    %c0_i32 = arith.constant 0 : i32
    %c0_i32_0 = arith.constant 0 : i32
    %c0_i32_1 = arith.constant 0 : i32
    return %c0_i32, %c0_i32_0 : i32, i32
  }
  func.func @transform_9(%arg0: i32) -> (i32, i32) {
    %c0_i32 = arith.constant 0 : i32
    %c0_i32_0 = arith.constant 0 : i32
    %c0_i32_1 = arith.constant 0 : i32
    return %c0_i32, %c0_i32_0 : i32, i32
  }
  func.func @transform_10(%arg0: i32) -> (i32, i32) {
    %c0_i32 = arith.constant 0 : i32
    %c0_i32_0 = arith.constant 0 : i32
    %c0_i32_1 = arith.constant 0 : i32
    return %c0_i32, %c0_i32_0 : i32, i32
  }
  func.func @transform_11(%arg0: i32) -> (i32, i32) {
    %c0_i32 = arith.constant 0 : i32
    %c0_i32_0 = arith.constant 0 : i32
    %c0_i32_1 = arith.constant 0 : i32
    return %c0_i32, %c0_i32_0 : i32, i32
  }
  func.func @transform_12(%arg0: i32) -> (i32, i32) {
    %c0_i32 = arith.constant 0 : i32
    %c0_i32_0 = arith.constant 0 : i32
    %c0_i32_1 = arith.constant 0 : i32
    return %c0_i32, %c0_i32_0 : i32, i32
  }
  func.func @transform_13(%arg0: i32) -> (i32, i32) {
    %c0_i32 = arith.constant 0 : i32
    %c0_i32_0 = arith.constant 0 : i32
    %c0_i32_1 = arith.constant 0 : i32
    return %c0_i32, %c0_i32_0 : i32, i32
  }
  func.func @transform_14(%arg0: i32) -> (i32, i32) {
    %c0_i32 = arith.constant 0 : i32
    %c0_i32_0 = arith.constant 0 : i32
    %c0_i32_1 = arith.constant 0 : i32
    return %c0_i32, %c0_i32_0 : i32, i32
  }
  func.func @transform_15(%arg0: i32) -> (i32, i32) {
    %c0_i32 = arith.constant 0 : i32
    %c0_i32_0 = arith.constant 0 : i32
    %c0_i32_1 = arith.constant 0 : i32
    return %c0_i32, %c0_i32_0 : i32, i32
  }
  func.func @transform_16(%arg0: i32) -> (i32, i32) {
    %c0_i32 = arith.constant 0 : i32
    %c0_i32_0 = arith.constant 0 : i32
    %c0_i32_1 = arith.constant 0 : i32
    return %c0_i32, %c0_i32_0 : i32, i32
  }
  func.func @transform_17(%arg0: i32) -> (i32, i32, i32) {
    %c0_i32 = arith.constant 0 : i32
    %c0_i32_0 = arith.constant 0 : i32
    %c0_i32_1 = arith.constant 0 : i32
    return %arg0, %c0_i32, %c0_i32_0 : i32, i32, i32
  }
}

</mosaic_0001>

<bundles_post_ra>
// kernel: tpu_custom_call.1
= control target key start
LH: loop header
LB: loop body
LE: loop exit
PB: predicated region body
PF: predicated region fallthrough
CT: control target
= control target key end

     0   :  { %s1714_s24 = smov 0   ;;  %s1883_s0 = inlined_call_operand.vmem [shape: f32[2,1,16], index: 0, kind: input, shape index: {}]   ;;  %s1884_s1 = inlined_call_operand.vmem [shape: f32[2,1,16], index: 1, kind: input, shape index: {}]   ;;  %s1885_s2 = inlined_call_operand.vmem [shape: f32[2,4,16], index: 2, kind: input, shape index: {}]   ;;  %s1886_s3 = inlined_call_operand.vmem [shape: bf16[32,12], index: 3, kind: input, shape index: {}]   ;;  %s1887_s4 = inlined_call_operand.vmem [shape: f32[32,1], index: 4, kind: input, shape index: {}]   ;;  %s1888_s5 = inlined_call_operand.vmem [shape: bf16[32,32], index: 5, kind: input, shape index: {}]   ;;  %s1889_s6 = inlined_call_operand.vmem [shape: f32[32,1], index: 6, kind: input, shape index: {}]   ;;  %s1890_s7 = inlined_call_operand.vmem [shape: bf16[32,64], index: 7, kind: input, shape index: {}]   ;;  %s1891_s8 = inlined_call_operand.vmem [shape: f32[32,1], index: 8, kind: input, shape index: {}]   ;;  %s1892_s9 = inlined_call_operand.vmem [shape: bf16[32,32], index: 9, kind: input, shape index: {}]   ;;  %s1893_s10 = inlined_call_operand.vmem [shape: f32[32,1], index: 10, kind: input, shape index: {}]   ;;  %s1894_s11 = inlined_call_operand.vmem [shape: bf16[32,64], index: 11, kind: input, shape index: {}]   ;;  %s1895_s12 = inlined_call_operand.vmem [shape: f32[32,1], index: 12, kind: input, shape index: {}]   ;;  %s1896_s13 = inlined_call_operand.vmem [shape: bf16[32,32], index: 13, kind: input, shape index: {}]   ;;  %s1897_s14 = inlined_call_operand.vmem [shape: f32[32,1], index: 14, kind: input, shape index: {}]   ;;  %s1898_s15 = inlined_call_operand.vmem [shape: bf16[32,32], index: 15, kind: input, shape index: {}]   ;;  %s1899_s16 = inlined_call_operand.vmem [shape: f32[32,1], index: 16, kind: input, shape index: {}]   ;;  %s1900_s17 = inlined_call_operand.vmem [shape: f32[2,32,9], index: 17, kind: output, shape index: {}]  }
   0x1   :  { %1902 = sst [smem:[#allocation3_spill]] %s1883_s0 }
   0x2   :  { %1903 = sst [smem:[#allocation4_spill]] %s1884_s1 }
   0x3 LB: > { %1904 = sst [smem:[#allocation2_spill]] %s1618_s24  ;;  %s1430_s25 = sadd.s32 4294967295, %s1618_s24   ;;  %s1618_s24 = sphi %s1714_s24, %s27_s24  }
   0x4   : > { %p1434_p0 = scmp.ge.s32.totalorder %s1618_s24, 1  ;;  %p502_p1 = scmp.lt.s32.totalorder %s1618_s24, 3 }
   0x6   : > { %p503_p2 = pnand %p1434_p0, %p502_p1 }
   0x7   : > { %p559_p3 = scmp.lt.s32.totalorder (!%p503_p2), %s1430_s25, 1  ;;  %v587_v0 = vlaneseq (!%p503_p2)  ;;  %s1905_s28 = sld [smem:[#allocation3_spill]] (!%p503_p2)  ;;  %v1598_v3 = vld [vmem:[%s1886_s3] sm:$0xff] (!%p503_p2)   ;;  %vm664_vm0 = vcmask (!%p503_p2), 97280   ;;  %v1621_v8 = vmov (!%p503_p2), 0   ;;  %v623_v10 = vld [vmem:[%s1887_s4 + $0x10] sm:$0xff] (!%p503_p2) }
   0x8   : > { %506 = sbr.rel (%p503_p2) target bundleno = 1983 (0x7bf), region = 88  ;;  %s1906_s20 = sld [smem:[#allocation4_spill]] (!%p503_p2)  ;;  %1503 = vmatprep.mubr.msk.bf16.mxu0 (!%p503_p2), %vm664_vm0, %v1598_v3  ;;  %1576 = vset.pattern.permute.xlu1 (!%p503_p2), %v1621_v8  ;;  %v621_v9 = vld [vmem:[%s1887_s4] sm:$0xff] (!%p503_p2)  ;;  %v622_v11 = vld [vmem:[%s1887_s4 + $0x8] sm:$0xff] (!%p503_p2)  ;;  %v624_v12 = vld [vmem:[%s1887_s4 + $0x18] sm:$0xff] (!%p503_p2)  ;;  %vm609_vm1 = vcmask (!%p503_p2), 1040384  }
   0x9   : > { %v588_v1 = vshrl.u32 (!%p503_p2), %v587_v0, 7  ;;  %s1620_s26 = smov (!%p503_p2), 124   ;;  %1577 = vset.pattern.permute.xlu0 (!%p503_p2), %v1621_v8  ;;  %v629_v13 = vld [vmem:[%s1889_s6] sm:$0xff] (!%p503_p2)  ;;  %v630_v14 = vld [vmem:[%s1889_s6 + $0x8] sm:$0xff] (!%p503_p2)  ;;  %v631_v15 = vld [vmem:[%s1889_s6 + $0x10] sm:$0xff] (!%p503_p2)  ;;  %vm611_vm2 = vcmask (!%p503_p2), 1041408  }
   0xa   : > { %v632_v16 = vld [vmem:[%s1889_s6 + $0x18] sm:$0xff] (!%p503_p2)  ;;  %vm613_vm3 = vcmask (!%p503_p2), 1042432   ;;  %vm615_vm4 = vcmask (!%p503_p2), 1043456   ;;  %vm671_vm5 = vcmask (!%p503_p2), 1045504   ;;  %v1599_v27 = vld [vmem:[%s1886_s3 + $0x8] sm:$0xff] (!%p503_p2)   ;;  %v1600_v28 = vld [vmem:[%s1888_s5] sm:$0xff] (!%p503_p2)  }
   0xb   : > { %v589_v2 = vsub.s32 (!%p503_p2), 0, %v588_v1  ;;  %vm760_vm6 = vcmask (!%p503_p2), 261120   ;;  %v1601_v47 = vld [vmem:[%s1888_s5 + $0x8] sm:$0xff] (!%p503_p2)   ;;  %vm890_vm7 = vcmask (!%p503_p2), 523264   ;;  %s1623_s19 = smov (!%p503_p2), 127   ;;  %vm1352_vm8 = vcmask (!%p503_p2), 72704  }
   0xc   : > { %1511 = vmatprep.mubr.msk.bf16.mxu1 (!%p503_p2), %vm760_vm6, %v1600_v28 }
   0xf   : > { %s1909_s25 = smov (!%p559_p3, %s1430_s25), 1 }
  0x10   : > { %s561_s29 = scalar_lea.vmem %s1905_s28, %s1909_s25  ;;  %s1435_s18 = sshll.u32 %s1909_s25, 2 }
  0x11   : > { %v575_v4 = vld [vmem:[%s561_s29] sm:$0x1]  ;;  %s564_s21 = scalar_lea.vmem %s1906_s20, %s1909_s25  ;;  %s568_s24 = scalar_lea.vmem %s1885_s2, %s1435_s18 }
  0x12   : > { %v590_v5 = vrot.slane %v575_v4, %v589_v2  ;;  %v577_v6 = vld [vmem:[%s568_s24] sm:$0xf] }
  0x13   : > { %606 = vrot.lane.b32.xlu1 %v577_v6, %s1620_s26  ;;  %v1438_v7 = vld [vmem:[%s564_s21] ss:$0 sm:$0xff]  ;;  %v604_v19 = vrot.slane %v577_v6, 4  ;;  %s1622_s21 = smov 126  }
  0x14   : > { %591 = vrot.lane.b32.xlu0 %v590_v5, %s1620_s26 }
  0x17   : > { %636 = vperm.xlu1 %1576, %v621_v9   ;;  %v845_v9 = vld [vmem:[%s1891_s8 + $0x8] sm:$0xff] }
  0x18   : > { %600 = vrot.lane.b32.xlu0 %v1438_v7, %s1620_s26  ;;  %s1469_s26 = sshll.u32 %s1909_s25, 5 }
  0x19   : > { %s573_s0 = scalar_lea.vmem %s1900_s17, %s1469_s26 }
  0x1b   : > { %646 = vperm.xlu1 %1576, %v623_v10   ;;  %v844_v10 = vld [vmem:[%s1891_s8] sm:$0xff] }
  0x1c   : > { %641 = vperm.xlu0 %1577, %v622_v11   ;;  %v847_v11 = vld [vmem:[%s1891_s8 + $0x18] sm:$0xff] }
  0x1f   : > { %651 = vperm.xlu1 %1576, %v624_v12   ;;  %v846_v12 = vld [vmem:[%s1891_s8 + $0x10] sm:$0xff] }
  0x20   : > { %732 = vperm.xlu0 %1577, %v629_v13   ;;  %v853_v13 = vld [vmem:[%s1893_s10 + $0x8] sm:$0xff] }
  0x23   : > { %737 = vperm.xlu1 %1576, %v630_v14   ;;  %v852_v14 = vld [vmem:[%s1893_s10] sm:$0xff] }
  0x24   : > { %742 = vperm.xlu0 %1577, %v631_v15   ;;  %v855_v15 = vld [vmem:[%s1893_s10 + $0x18] sm:$0xff] }
  0x27   : > { %747 = vperm.xlu1 %1576, %v632_v16   ;;  %v854_v16 = vld [vmem:[%s1893_s10 + $0x10] sm:$0xff] }
  0x85   : > { %v607_v22 = vpop.permute.xlu1 %606 }
  0x86   : > { %v592_v17 = vpop.permute.xlu0 %591 }
  0x87   : > { %v610_v18 = vsel %vm609_vm1, %v575_v4, %v592_v17  ;;  %v1602_v4 = vld [vmem:[%s1890_s7] sm:$0xff]  }
  0x88   : > { %v612_v20 = vsel %vm611_vm2, %v610_v18, %v1438_v7 }
  0x8a   : > { %v601_v21 = vpop.permute.xlu0 %600 }
  0x8b   : > { %v614_v23 = vsel %vm613_vm3, %v612_v20, %v601_v21 }
  0x8c   : > { %v616_v24 = vsel %vm615_vm4, %v614_v23, %v604_v19 }
  0x8d   : > { %v633_v25 = vpack.c.bf16 %v607_v22, %v616_v24 }
  0x8f   : > { %1563 = vmatprep.subr.msk.bf16.mxu0 %vm671_vm5, %v633_v25  ;;  %v673_v26 = vsel %vm671_vm5, %v633_v25, 0  ;;  %v1603_v25 = vld [vmem:[%s1890_s7 + $0x8] sm:$0xff]  }
  0x90   : > { %1502 = vmatpush3.bf16.msra.mxu0 %v673_v26  ;;  %v1604_v26 = vld [vmem:[%s1892_s9] sm:$0xff]  }
  0x93   : > { %1504 = vmatmul.mubr.msk.bf16.vlgmr.msra.gmra.mrb[0].mxu0 %vm664_vm0, %v1599_v27 }
  0x94   : > { %1523 = vmatprep.mubr.msk.bf16.mxu0 %vm890_vm7, %v1602_v4 }
  0x96   : > { %v637_v29 = vpop.permute.xlu1 %636 }
  0x9a   : > { %v647_v30 = vpop.permute.xlu1 %646 }
  0x9b   : > { %v642_v36 = vpop.permute.xlu0 %641 }
  0x9e   : > { %v652_v33 = vpop.permute.xlu1 %651 }
  0x9f   : > { %v733_v48 = vpop.permute.xlu0 %732 }
  0xa2   : > { %v738_v49 = vpop.permute.xlu1 %737 }
  0xa3   : > { %v743_v50 = vpop.permute.xlu0 %742 }
  0xa6   : > { %v748_v54 = vpop.permute.xlu1 %747 }
 0x166   : > { %v1505_v31 = vpop.f32.mrb[0].mxu0 }
 0x167   : > { %v709_v32 = vpop.f32.mrb[1].mxu0  ;;  %v718_v39 = vadd.f32 %v1505_v31, %v647_v30 }
 0x168   : > { %v710_v34 = vadd.f32 %v709_v32, %v637_v29  ;;  %v1506_v35 = vpop.f32.mrb[2].mxu0 }
 0x169   : > { %v721_v37 = vadd.f32 %v1506_v35, %v652_v33  ;;  %v712_v38 = vpop.f32.mrb[3].mxu0  ;;  %v726_v44 = vmax.f32 %v718_v39, 0.0 }
 0x16a   : > { %v713_v40 = vadd.f32 %v712_v38, %v642_v36  ;;  %v724_v41 = vmax.f32 %v710_v34, 0.0 }
 0x16b   : > { %v727_v42 = vmax.f32 %v721_v37, 0.0 }
 0x16c   : > { %v725_v43 = vmax.f32 %v713_v40, 0.0 }
 0x16d   : > { %v729_v46 = vpack.c.bf16 %v727_v42, %v726_v44 }
 0x16e   : > { %v728_v45 = vpack.c.bf16 %v725_v43, %v724_v41 }
 0x170   : > { %1507 = vmatprep.subr.bf16.mxu1 %v728_v45 }
 0x171   : > { %1508 = vmatpush3.bf16.msra.mxu1 %v728_v45  ;;  %v1605_v45 = vld [vmem:[%s1892_s9 + $0x8] sm:$0xff]  }
 0x172   : > { %1509 = vmatprep.subr.bf16.mxu1 %v729_v46 }
 0x175   : > { %1510 = vmatpush3.bf16.msra.mxu1 %v729_v46 }
 0x178   : > { %1512 = vmatmul.mubr.msk.bf16.vlgmr.msra.gmra.mrb[0].mxu1 %vm760_vm6, %v1601_v47 }
 0x179   : > { %1531 = vmatprep.mubr.msk.bf16.mxu1 %vm760_vm6, %v1604_v26 }
 0x24b   : > { %v1513_v51 = vpop.f32.mrb[0].mxu1 }
 0x24c   : > { %v810_v52 = vadd.f32 %v1513_v51, %v743_v50  ;;  %v801_v53 = vpop.f32.mrb[1].mxu1 }
 0x24d   : > { %v802_v55 = vadd.f32 %v801_v53, %v733_v48  ;;  %v1514_v56 = vpop.f32.mrb[2].mxu1 }
 0x24e   : > { %v818_v57 = vadd.f32 %v810_v52, %v718_v39  ;;  %v813_v58 = vadd.f32 %v1514_v56, %v748_v54  ;;  %v804_v59 = vpop.f32.mrb[3].mxu1 }
 0x24f   : > { %v816_v60 = vadd.f32 %v802_v55, %v710_v34  ;;  %v805_v61 = vadd.f32 %v804_v59, %v738_v49 }
 0x250   : > { %v819_v62 = vadd.f32 %v813_v58, %v721_v37  ;;  %v822_v0 = vmax.f32 %v818_v57, 0.0 }
 0x251   : > { %v817_v63 = vadd.f32 %v805_v61, %v713_v40  ;;  %v820_v2 = vmax.f32 %v816_v60, 0.0 }
 0x252   : > { %v823_v1 = vmax.f32 %v819_v62, 0.0 }
 0x253   : > { %v821_v3 = vmax.f32 %v817_v63, 0.0 }
 0x254   : > { %v1583_v5 = vpack.i.bf16 %v823_v1, %v822_v0  ;;  %v857_v6 = vpack.c.bf16 %v823_v1, %v822_v0 }
 0x255   : > { %v1578_v7 = vpack.i.bf16 %v821_v3, %v820_v2  ;;  %v856_v8 = vpack.c.bf16 %v821_v3, %v820_v2  ;;  %v1606_v2 = vld [vmem:[%s1894_s11] sm:$0xff]  }
 0x256   : > { %1584 = vrot.lane.b32.xlu1 %v1583_v5, %s1622_s21 }
 0x257   : > { %1579 = vrot.lane.b32.xlu0 %v1578_v7, %s1622_s21  ;;  %1515 = vmatprep.subr.bf16.mxu0 %v856_v8  ;;  %v1066_v7 = vld [vmem:[%s1895_s12 + $0x8] sm:$0xff] }
 0x258   : > { %1516 = vmatpush3.bf16.msra.mxu0 %v856_v8  ;;  %v1065_v8 = vld [vmem:[%s1895_s12] sm:$0xff] }
 0x259   : > { %1517 = vmatprep.subr.bf16.mxu0 %v857_v6 }
 0x25a   : > { %867 = vperm.xlu1 %1576, %v845_v9   ;;  %v1068_v9 = vld [vmem:[%s1895_s12 + $0x18] sm:$0xff] }
 0x25b   : > { %862 = vperm.xlu0 %1577, %v844_v10   ;;  %v1067_v10 = vld [vmem:[%s1895_s12 + $0x10] sm:$0xff] }
 0x25c   : > { %1518 = vmatpush3.bf16.msra.mxu0 %v857_v6 }
 0x25e   : > { %877 = vperm.xlu1 %1576, %v847_v11   ;;  %v1074_v11 = vld [vmem:[%s1897_s14 + $0x8] sm:$0xff] }
 0x25f   : > { %872 = vperm.xlu0 %1577, %v846_v12   ;;  %v1073_v12 = vld [vmem:[%s1897_s14] sm:$0xff] }
 0x262   : > { %959 = vperm.xlu1 %1576, %v853_v13   ;;  %v1076_v13 = vld [vmem:[%s1897_s14 + $0x18] sm:$0xff] }
 0x263   : > { %954 = vperm.xlu0 %1577, %v852_v14   ;;  %v1075_v14 = vld [vmem:[%s1897_s14 + $0x10] sm:$0xff] }
 0x266   : > { %969 = vperm.xlu1 %1576, %v855_v15   ;;  %v583_v15 = vld [vmem:[%s1899_s16 + $0x8] sm:$0xff] }
 0x267   : > { %964 = vperm.xlu0 %1577, %v854_v16   ;;  %v582_v16 = vld [vmem:[%s1899_s16] sm:$0xff] }
 0x2c8   : > { %v1585_v17 = vpop.permute.xlu1 %1584 }
 0x2c9   : > { %v1580_v18 = vpop.permute.xlu0 %1579  ;;  %v1587_v19 = vunpack.i.h.bf16 %v1585_v17  ;;  %v1586_v20 = vunpack.i.l.bf16 %v1585_v17  ;;  %v585_v17 = vld [vmem:[%s1899_s16 + $0x18] sm:$0xff] }
 0x2ca   : > { %v1582_v21 = vunpack.i.h.bf16 %v1580_v18  ;;  %v1581_v22 = vunpack.i.l.bf16 %v1580_v18  ;;  %v584_v18 = vld [vmem:[%s1899_s16 + $0x10] sm:$0xff] }
 0x2cb   : > { %v859_v24 = vpack.c.bf16 %v1587_v19, %v1586_v20 }
 0x2cc   : > { %v858_v23 = vpack.c.bf16 %v1582_v21, %v1581_v22 }
 0x2ce   : > { %1519 = vmatprep.subr.bf16.mxu0 %v858_v23 }
 0x2cf   : > { %1520 = vmatpush3.bf16.msra.mxu0 %v858_v23 }
 0x2d0   : > { %1521 = vmatprep.subr.bf16.mxu0 %v859_v24 }
 0x2d3   : > { %1522 = vmatpush3.bf16.msra.mxu0 %v859_v24 }
 0x2d6   : > { %1524 = vmatmul.mubr.msk.bf16.vlgmr.msra.gmra.mrb[4].mxu0 %vm890_vm7, %v1603_v25 }
 0x2d9   : > { %v868_v27 = vpop.permute.xlu1 %867 }
 0x2da   : > { %v863_v28 = vpop.permute.xlu0 %862 }
 0x2dd   : > { %v878_v31 = vpop.permute.xlu1 %877 }
 0x2de   : > { %v873_v34 = vpop.permute.xlu0 %872 }
 0x2e1   : > { %v960_v47 = vpop.permute.xlu1 %959 }
 0x2e2   : > { %v955_v46 = vpop.permute.xlu0 %954 }
 0x2e5   : > { %v970_v52 = vpop.permute.xlu1 %969 }
 0x2e6   : > { %v965_v48 = vpop.permute.xlu0 %964 }
 0x3a9   : > { %v1525_v29 = vpop.f32.mrb[4].mxu0 }
 0x3aa   : > { %v931_v30 = vpop.f32.mrb[5].mxu0  ;;  %v940_v37 = vadd.f32 %v1525_v29, %v873_v34 }
 0x3ab   : > { %v932_v32 = vadd.f32 %v931_v30, %v863_v28  ;;  %v1526_v33 = vpop.f32.mrb[6].mxu0  ;;  %v1608_v28 = vld [vmem:[%s1896_s13] sm:$0xff]  }
 0x3ac   : > { %v943_v35 = vadd.f32 %v1526_v33, %v878_v31  ;;  %v934_v36 = vpop.f32.mrb[7].mxu0  ;;  %v948_v42 = vmax.f32 %v940_v37, 0.0  ;;  %1551 = vmatprep.mubr.msk.bf16.mxu0 %vm760_vm6, %v1608_v28 }
 0x3ad   : > { %v935_v38 = vadd.f32 %v934_v36, %v868_v27  ;;  %v946_v39 = vmax.f32 %v932_v32, 0.0  ;;  %v1607_v27 = vld [vmem:[%s1894_s11 + $0x8] sm:$0xff]  }
 0x3ae   : > { %v949_v40 = vmax.f32 %v943_v35, 0.0 }
 0x3af   : > { %v947_v41 = vmax.f32 %v935_v38, 0.0 }
 0x3b0   : > { %v951_v44 = vpack.c.bf16 %v949_v40, %v948_v42 }
 0x3b1   : > { %v950_v43 = vpack.c.bf16 %v947_v41, %v946_v39 }
 0x3b3   : > { %1527 = vmatprep.subr.bf16.mxu1 %v950_v43 }
 0x3b4   : > { %1528 = vmatpush3.bf16.msra.mxu1 %v950_v43 }
 0x3b5   : > { %1529 = vmatprep.subr.bf16.mxu1 %v951_v44 }
 0x3b8   : > { %1530 = vmatpush3.bf16.msra.mxu1 %v951_v44 }
 0x3bb   : > { %1532 = vmatmul.mubr.msk.bf16.vlgmr.msra.gmra.mrb[4].mxu1 %vm760_vm6, %v1605_v45 }
 0x3bc   : > { %1543 = vmatprep.mubr.msk.bf16.mxu1 %vm890_vm7, %v1606_v2 }
 0x48e   : > { %v1533_v49 = vpop.f32.mrb[4].mxu1 }
 0x48f   : > { %v1031_v50 = vadd.f32 %v1533_v49, %v965_v48  ;;  %v1022_v51 = vpop.f32.mrb[5].mxu1  ;;  %v1610_v48 = vld [vmem:[%s1898_s15] sm:$0xff]  }
 0x490   : > { %v1023_v53 = vadd.f32 %v1022_v51, %v955_v46  ;;  %v1534_v54 = vpop.f32.mrb[6].mxu1 }
 0x491   : > { %v1039_v55 = vadd.f32 %v1031_v50, %v940_v37  ;;  %v1034_v56 = vadd.f32 %v1534_v54, %v970_v52  ;;  %v1025_v57 = vpop.f32.mrb[7].mxu1 }
 0x492   : > { %v1037_v58 = vadd.f32 %v1023_v53, %v932_v32  ;;  %v1026_v59 = vadd.f32 %v1025_v57, %v960_v47  ;;  %v1609_v47 = vld [vmem:[%s1896_s13 + $0x8] sm:$0xff]  }
 0x493   : > { %v1040_v60 = vadd.f32 %v1034_v56, %v943_v35  ;;  %v1043_v62 = vmax.f32 %v1039_v55, 0.0 }
 0x494   : > { %v1038_v61 = vadd.f32 %v1026_v59, %v935_v38  ;;  %v1041_v0 = vmax.f32 %v1037_v58, 0.0 }
 0x495   : > { %v1044_v63 = vmax.f32 %v1040_v60, 0.0 }
 0x496   : > { %v1042_v1 = vmax.f32 %v1038_v61, 0.0 }
 0x497   : > { %v1593_v3 = vpack.i.bf16 %v1044_v63, %v1043_v62  ;;  %v1078_v4 = vpack.c.bf16 %v1044_v63, %v1043_v62 }
 0x498   : > { %v1588_v5 = vpack.i.bf16 %v1042_v1, %v1041_v0  ;;  %v1077_v6 = vpack.c.bf16 %v1042_v1, %v1041_v0 }
 0x499   : > { %1594 = vrot.lane.b32.xlu1 %v1593_v3, %s1623_s19 }
 0x49a   : > { %1589 = vrot.lane.b32.xlu0 %v1588_v5, %s1623_s19  ;;  %1535 = vmatprep.subr.bf16.mxu1 %v1077_v6 }
 0x49b   : > { %1536 = vmatpush3.bf16.msra.mxu1 %v1077_v6 }
 0x49c   : > { %1537 = vmatprep.subr.bf16.mxu1 %v1078_v4 }
 0x49d   : > { %1088 = vperm.xlu1 %1576, %v1066_v7   ;;  %v1611_v7 = vld [vmem:[%s1898_s15 + $0x8] sm:$0xff]  }
 0x49e   : > { %1083 = vperm.xlu0 %1577, %v1065_v8  }
 0x49f   : > { %1538 = vmatpush3.bf16.msra.mxu1 %v1078_v4 }
 0x4a1   : > { %1098 = vperm.xlu1 %1576, %v1068_v9  }
 0x4a2   : > { %1093 = vperm.xlu0 %1577, %v1067_v10  }
 0x4a5   : > { %1179 = vperm.xlu1 %1576, %v1074_v11  }
 0x4a6   : > { %1174 = vperm.xlu0 %1577, %v1073_v12  }
 0x4a9   : > { %1189 = vperm.xlu1 %1576, %v1076_v13  }
 0x4aa   : > { %1184 = vperm.xlu0 %1577, %v1075_v14  }
 0x4ad   : > { %1274 = vperm.xlu1 %1576, %v583_v15  }
 0x4ae   : > { %1269 = vperm.xlu0 %1577, %v582_v16  }
 0x4b1   : > { %1284 = vperm.xlu1 %1576, %v585_v17  }
 0x4b2   : > { %1279 = vperm.xlu0 %1577, %v584_v18  }
 0x50b   : > { %v1595_v19 = vpop.permute.xlu1 %1594 }
 0x50c   : > { %v1590_v20 = vpop.permute.xlu0 %1589  ;;  %v1597_v21 = vunpack.i.h.bf16 %v1595_v19  ;;  %v1596_v22 = vunpack.i.l.bf16 %v1595_v19 }
 0x50d   : > { %v1592_v23 = vunpack.i.h.bf16 %v1590_v20  ;;  %v1591_v24 = vunpack.i.l.bf16 %v1590_v20 }
 0x50e   : > { %v1080_v26 = vpack.c.bf16 %v1597_v21, %v1596_v22 }
 0x50f   : > { %v1079_v25 = vpack.c.bf16 %v1592_v23, %v1591_v24 }
 0x511   : > { %1539 = vmatprep.subr.bf16.mxu1 %v1079_v25 }
 0x512   : > { %1540 = vmatpush3.bf16.msra.mxu1 %v1079_v25 }
 0x513   : > { %1541 = vmatprep.subr.bf16.mxu1 %v1080_v26 }
 0x516   : > { %1542 = vmatpush3.bf16.msra.mxu1 %v1080_v26 }
 0x519   : > { %1544 = vmatmul.mubr.msk.bf16.vlgmr.msra.gmra.mrb[8].mxu1 %vm890_vm7, %v1607_v27 }
 0x51c   : > { %v1089_v29 = vpop.permute.xlu1 %1088 }
 0x51d   : > { %v1084_v30 = vpop.permute.xlu0 %1083 }
 0x520   : > { %v1099_v33 = vpop.permute.xlu1 %1098 }
 0x521   : > { %v1094_v36 = vpop.permute.xlu0 %1093 }
 0x524   : > { %v1180_v50 = vpop.permute.xlu1 %1179 }
 0x525   : > { %v1175_v49 = vpop.permute.xlu0 %1174 }
 0x528   : > { %v1190_v55 = vpop.permute.xlu1 %1189 }
 0x529   : > { %v1185_v51 = vpop.permute.xlu0 %1184 }
 0x52c   : > { %v1275_v9 = vpop.permute.xlu1 %1274 }
 0x52d   : > { %v1270_v8 = vpop.permute.xlu0 %1269 }
 0x530   : > { %v1285_v14 = vpop.permute.xlu1 %1284 }
 0x531   : > { %v1280_v10 = vpop.permute.xlu0 %1279 }
 0x5ec   : > { %v1545_v31 = vpop.f32.mrb[8].mxu1 }
 0x5ed   : > { %v1151_v32 = vpop.f32.mrb[9].mxu1  ;;  %v1160_v39 = vadd.f32 %v1545_v31, %v1094_v36 }
 0x5ee   : > { %v1152_v34 = vadd.f32 %v1151_v32, %v1084_v30  ;;  %v1546_v35 = vpop.f32.mrb[10].mxu1 }
 0x5ef   : > { %v1163_v37 = vadd.f32 %v1546_v35, %v1099_v33  ;;  %v1154_v38 = vpop.f32.mrb[11].mxu1  ;;  %v1168_v44 = vmax.f32 %v1160_v39, 0.0 }
 0x5f0   : > { %v1155_v40 = vadd.f32 %v1154_v38, %v1089_v29  ;;  %v1166_v41 = vmax.f32 %v1152_v34, 0.0 }
 0x5f1   : > { %v1169_v42 = vmax.f32 %v1163_v37, 0.0 }
 0x5f2   : > { %v1167_v43 = vmax.f32 %v1155_v40, 0.0 }
 0x5f3   : > { %v1171_v46 = vpack.c.bf16 %v1169_v42, %v1168_v44 }
 0x5f4   : > { %v1170_v45 = vpack.c.bf16 %v1167_v43, %v1166_v41 }
 0x5f6   : > { %1547 = vmatprep.subr.bf16.mxu0 %v1170_v45 }
 0x5f7   : > { %1548 = vmatpush3.bf16.msra.mxu0 %v1170_v45 }
 0x5f8   : > { %1549 = vmatprep.subr.bf16.mxu0 %v1171_v46 }
 0x5fb   : > { %1550 = vmatpush3.bf16.msra.mxu0 %v1171_v46 }
 0x5fe   : > { %1552 = vmatmul.mubr.msk.bf16.vlgmr.msra.gmra.mrb[8].mxu0 %vm760_vm6, %v1609_v47 }
 0x5ff   : > { %1559 = vmatprep.mubr.msk.bf16.mxu0 %vm760_vm6, %v1610_v48 }
 0x6d1   : > { %v1553_v52 = vpop.f32.mrb[8].mxu0 }
 0x6d2   : > { %v1251_v53 = vadd.f32 %v1553_v52, %v1185_v51  ;;  %v1242_v54 = vpop.f32.mrb[9].mxu0 }
 0x6d3   : > { %v1243_v56 = vadd.f32 %v1242_v54, %v1175_v49  ;;  %v1554_v57 = vpop.f32.mrb[10].mxu0 }
 0x6d4   : > { %v1259_v58 = vadd.f32 %v1251_v53, %v1160_v39  ;;  %v1254_v59 = vadd.f32 %v1554_v57, %v1190_v55  ;;  %v1245_v60 = vpop.f32.mrb[11].mxu0 }
 0x6d5   : > { %v1257_v61 = vadd.f32 %v1243_v56, %v1152_v34  ;;  %v1246_v62 = vadd.f32 %v1245_v60, %v1180_v50 }
 0x6d6   : > { %v1260_v63 = vadd.f32 %v1254_v59, %v1163_v37  ;;  %v1263_v1 = vmax.f32 %v1259_v58, 0.0 }
 0x6d7   : > { %v1258_v0 = vadd.f32 %v1246_v62, %v1155_v40  ;;  %v1261_v3 = vmax.f32 %v1257_v61, 0.0 }
 0x6d8   : > { %v1264_v2 = vmax.f32 %v1260_v63, 0.0 }
 0x6d9   : > { %v1262_v4 = vmax.f32 %v1258_v0, 0.0 }
 0x6da   : > { %v1266_v5 = vpack.c.bf16 %v1264_v2, %v1263_v1 }
 0x6db   : > { %v1265_v6 = vpack.c.bf16 %v1262_v4, %v1261_v3 }
 0x6dd   : > { %1555 = vmatprep.subr.bf16.mxu0 %v1265_v6 }
 0x6de   : > { %1556 = vmatpush3.bf16.msra.mxu0 %v1265_v6 }
 0x6df   : > { %1557 = vmatprep.subr.bf16.mxu0 %v1266_v5 }
 0x6e2   : > { %1558 = vmatpush3.bf16.msra.mxu0 %v1266_v5 }
 0x6e5   : > { %1560 = vmatmul.mubr.msk.bf16.vlgmr.msra.gmra.mrb[12].mxu0 %vm760_vm6, %v1611_v7 }
 0x7b8   : > { %v1561_v11 = vpop.f32.mrb[12].mxu0 }
 0x7b9   : > { %v1346_v12 = vadd.f32 %v1561_v11, %v1280_v10  ;;  %v1337_v13 = vpop.f32.mrb[13].mxu0 }
 0x7ba   : > { %v1338_v15 = vadd.f32 %v1337_v13, %v1270_v8  ;;  %v1562_v16 = vpop.f32.mrb[14].mxu0 }
 0x7bb   : > { %1355 = vst.msk [vmem:[%s573_s0 + $0x10] sm:$0xff] %vm1352_vm8, %v1346_v12  ;;  %v1349_v17 = vadd.f32 %v1562_v16, %v1285_v14  ;;  %v1340_v18 = vpop.f32.mrb[15].mxu0 }
 0x7bc   : > { %1353 = vst.msk [vmem:[%s573_s0] sm:$0xff] %vm1352_vm8, %v1338_v15  ;;  %v1341_v19 = vadd.f32 %v1340_v18, %v1275_v9 }
 0x7bd   : > { %1356 = vst.msk [vmem:[%s573_s0 + $0x18] sm:$0xff] %vm1352_vm8, %v1349_v17 }
 0x7be   : > { %1354 = vst.msk [vmem:[%s573_s0 + $0x8] sm:$0xff] %vm1352_vm8, %v1341_v19 }
 0x7bf PF: > { %s1907_s25 = sld [smem:[#allocation2_spill]] }
 0x7c5   : > { %s27_s24 = sadd.s32 1, %s1907_s25  }
 0x7c6   : > { %p24_p4 = scmp.ge.s32.totalorder %s27_s24, 4  }
 0x7c8   :  { %26 = sbr.rel (!%p24_p4) target bundleno = 3 (0x3), region = 124 }

</bundles_post_ra>
